<compile_context>
chip_gen: v5e
topology: v5e:2x2
jax: 0.10.0
libtpu: 0.0.40
codegen_flags: <defaults>
</compile_context>

<pallas_src>
import functools

import jax
import jax.numpy as jnp
from jax.experimental import pallas as pl
from jax.experimental.pallas import tpu as pltpu

DROP_P = 0.4
INV_KEEP = 1.0 / (1.0 - DROP_P)
NEG_INF = -1e30
HIDDEN = 16
TARGET_BLOCK_NODES = 128   # default block fill target (MXU / lane width)


def _pack_param_slab(params, d):
    """Pack every parameter tensor into one (P, 16) f32 slab (single DMA)."""
    rd = ((d + 7) // 8) * 8                    # 8-sublane-aligned segment for w1
    off_w1, off_w2, off_wf1, off_vec = 0, rd, rd + HIDDEN, rd + 2 * HIDDEN
    P = rd + 3 * HIDDEN                        # w1 | w2 | wf1(pad) | 16 vector rows

    def row16(a):
        a = jnp.asarray(a, jnp.float32).reshape(1, -1)
        return jnp.pad(a, ((0, 0), (0, HIDDEN - a.shape[1])))

    slab = jnp.zeros((P, HIDDEN), jnp.float32)
    slab = slab.at[off_w1:off_w1 + d, :].set(params["w1"].astype(jnp.float32))
    slab = slab.at[off_w2:off_w2 + HIDDEN, :].set(params["w2"].astype(jnp.float32))
    slab = slab.at[off_wf1:off_wf1 + HIDDEN, 0:params["wf1"].shape[1]].set(
        params["wf1"].astype(jnp.float32))
    vec_rows = [params["att_src1"], params["att_dst1"], params["b1"],
                params["att_src2"], params["att_dst2"], params["b2"],
                params["bf1"], params["wf2_row"], params["bf2"]]
    for i, a in enumerate(vec_rows):
        slab = slab.at[off_vec + i:off_vec + i + 1, :].set(row16(a))
    offs = dict(off_w1=off_w1, off_w2=off_w2, off_wf1=off_wf1, off_vec=off_vec)
    return slab, offs


def _gat_block_kernel(idx_ref, x_ref, adj_ref, slab_ref, keep1_ref, keep2_ref,
                      out_ref, *, d, npg, off_w1, off_w2, off_wf1, off_vec):
    """One block of graphs: bn = graphs_per_block * nodes_per_graph nodes."""
    bn = adj_ref.shape[0]
    gpb = out_ref.shape[0]

    adjf = adj_ref[...].astype(jnp.float32)                     # (bn, bn) in {0, 1}
    x = x_ref[...]                                              # (bn, d)

    # --- parameters: static slices of the single packed slab (one DMA) ---
    w2 = slab_ref[off_w2:off_w2 + HIDDEN, :]                    # (16, 16)
    wf1 = slab_ref[off_wf1:off_wf1 + HIDDEN, :]                 # (16, 16), cols 8..15 zero
    a_s1 = slab_ref[off_vec + 0:off_vec + 1, :]
    a_d1 = slab_ref[off_vec + 1:off_vec + 2, :]
    b1 = slab_ref[off_vec + 2:off_vec + 3, :]
    a_s2 = slab_ref[off_vec + 3:off_vec + 4, :]
    a_d2 = slab_ref[off_vec + 4:off_vec + 5, :]
    b2 = slab_ref[off_vec + 5:off_vec + 6, :]
    bf1 = slab_ref[off_vec + 6:off_vec + 7, :]
    wf2 = slab_ref[off_vec + 7:off_vec + 8, :]
    bf2 = slab_ref[off_vec + 8:off_vec + 9, 0:1]

    def masked_softmax(e, mask):
        e = jnp.where(e > 0.0, e, 0.2 * e)                      # LeakyReLU(0.2)
        e = jnp.where(mask > 0.5, e, NEG_INF)                   # in-kernel edge mask
        m = jnp.max(e, axis=-1, keepdims=True)
        p = jnp.exp(e - m)
        return p * pl.reciprocal(jnp.sum(p, axis=-1, keepdims=True), approx=True)

    # ---- conv1 over all bn nodes (needed as layer-2 inputs) ----
    if d == 1:
        # K=1 linear is an outer product -> VPU broadcast multiply, no MXU round trip.
        h1_lin = x * slab_ref[off_w1:off_w1 + 1, :]             # (bn, 16)
    else:
        h1_lin = jnp.dot(x, slab_ref[off_w1:off_w1 + d, :],
                         preferred_element_type=jnp.float32)
    s1 = jnp.sum(h1_lin * a_s1, axis=-1, keepdims=True)         # source scores (bn, 1)
    d1 = jnp.sum(h1_lin * a_d1, axis=-1, keepdims=True)         # dest scores   (bn, 1)
    alpha1 = masked_softmax(d1 + jnp.transpose(s1), adjf)       # (bn, bn)
    h1 = jnp.maximum(
        jnp.dot(alpha1, h1_lin, preferred_element_type=jnp.float32) + b1, 0.0)
    h1 = h1 * (keep1_ref[...].astype(jnp.float32) * INV_KEEP)   # dropout p=0.4

    # ---- conv2 restricted to the gpb gathered gene rows ----
    h2_lin = jnp.dot(h1, w2, preferred_element_type=jnp.float32)        # (bn, 16)
    s2 = jnp.sum(h2_lin * a_s2, axis=-1, keepdims=True)                 # (bn, 1)
    # In-register one-hot selection built from a single SMEM scalar; gathers both the
    # selected h2_lin rows and the selected mask rows without a scratch round trip.
    col = jax.lax.broadcasted_iota(jnp.int32, (gpb, bn), 1)
    row = jax.lax.broadcasted_iota(jnp.int32, (gpb, bn), 0)
    onehot = (col == idx_ref[0] + row * npg).astype(jnp.float32)        # (gpb, bn)
    h2_lin_sel = jnp.dot(onehot, h2_lin, preferred_element_type=jnp.float32)
    adj_sel = jnp.dot(onehot, adjf, preferred_element_type=jnp.float32)
    d2 = jnp.sum(h2_lin_sel * a_d2, axis=-1, keepdims=True)             # (gpb, 1)
    alpha2 = masked_softmax(d2 + jnp.transpose(s2), adj_sel)            # (gpb, bn)
    h2_sel = jnp.maximum(
        jnp.dot(alpha2, h2_lin, preferred_element_type=jnp.float32) + b2, 0.0)

    # ---- fc head on the gathered rows ----
    f1 = jnp.maximum(
        jnp.dot(h2_sel, wf1, preferred_element_type=jnp.float32) + bf1, 0.0)
    f1 = f1 * (keep2_ref[...].astype(jnp.float32) * INV_KEEP)           # dropout p=0.4
    out_ref[...] = jnp.sum(f1 * wf2, axis=-1, keepdims=True) + bf2      # (gpb, 1)


def gat_inference_forward(params, x, adj, gene_idx, keep1, keep2, *,
                          num_graphs, graphs_per_block=None):
    """Pallas forward over a batched (block-diagonal) graph.

    adj:   dense (N, N) adjacency incl. self loops (any positive value = edge).
    keep1: (N, 16)  int8 dropout keep mask for the conv1 output.
    keep2: (num_graphs, 8) int8 dropout keep mask for the fc1 output.
    gene_idx: only gene_idx[0] is used (the module defines gene_idx[i] = gene_idx[0]
              + i * nodes_per_graph); it must be a node of the first graph.
    """
    N, d = x.shape
    npg = N // num_graphs
    if graphs_per_block is None:
        graphs_per_block = max(1, min(num_graphs, TARGET_BLOCK_NODES // max(npg, 1)))
        while num_graphs % graphs_per_block:
            graphs_per_block -= 1
    # TODO(synk): pad a ragged last block instead of requiring divisibility.
    assert num_graphs % graphs_per_block == 0
    gpb = graphs_per_block
    nb = num_graphs // gpb
    bn = gpb * npg

    # Scalar-prefetch arg: local gene index within each block (same for every block).
    idx0 = jnp.asarray(gene_idx, jnp.int32).reshape(-1)[0:1]             # (1,)

    x3 = x.astype(jnp.float32).reshape(nb, bn, d)
    # Compact int8 mask of the block-diagonal blocks only (off-diagonal zeros never DMA'd).
    adj4 = (adj > 0.0).astype(jnp.int8).reshape(nb, bn, nb, bn)
    adj3 = adj4[jnp.arange(nb), :, jnp.arange(nb), :]                    # (nb, bn, bn)
    keep1_3 = keep1.astype(jnp.int8).reshape(nb, bn, HIDDEN)
    keep2_p = jnp.pad(keep2.astype(jnp.int8),
                      ((0, 0), (0, HIDDEN - keep2.shape[1])))            # pad lanes to 16
    keep2_3 = keep2_p.reshape(nb, gpb, HIDDEN)

    slab, offs = _pack_param_slab(params, d)
    P = slab.shape[0]

    kernel = functools.partial(_gat_block_kernel, d=d, npg=npg, **offs)
    grid_spec = pltpu.PrefetchScalarGridSpec(
        num_scalar_prefetch=1,
        grid=(nb,),
        in_specs=[
            pl.BlockSpec((None, bn, d), lambda b, idx: (b, 0, 0)),        # x
            pl.BlockSpec((None, bn, bn), lambda b, idx: (b, 0, 0)),       # adj mask (int8)
            pl.BlockSpec((P, HIDDEN), lambda b, idx: (0, 0)),             # param slab (resident)
            pl.BlockSpec((None, bn, HIDDEN), lambda b, idx: (b, 0, 0)),   # dropout keep 1
            pl.BlockSpec((None, gpb, HIDDEN), lambda b, idx: (b, 0, 0)),  # dropout keep 2
        ],
        out_specs=pl.BlockSpec((None, gpb, 1), lambda b, idx: (b, 0, 0)),
    )
    out3 = pl.pallas_call(
        kernel,
        out_shape=jax.ShapeDtypeStruct((nb, gpb, 1), jnp.float32),
        grid_spec=grid_spec,
        compiler_params=pltpu.CompilerParams(dimension_semantics=("parallel",)),
    )(idx0, x3, adj3, slab, keep1_3, keep2_3)
    return out3.reshape(num_graphs, 1)


def _reference_forward(params, x, adj, gene_idx, keep1, keep2):
    """Pure-JAX reference of the same forward pass (correctness check)."""
    mask = adj > 0.0
    inv = 1.0 / (1.0 - DROP_P)

    def gat(h_in, w, a_s, a_d, b):
        h = h_in @ w
        a_src = jnp.sum(h * a_s, axis=-1, keepdims=True)
        a_dst = jnp.sum(h * a_d, axis=-1, keepdims=True)
        e = a_dst + a_src.T
        e = jnp.where(e > 0.0, e, 0.2 * e)
        e = jnp.where(mask, e, NEG_INF)
        alpha = jax.nn.softmax(e, axis=-1)
        return alpha @ h + b

    h1 = jnp.maximum(gat(x, params["w1"], params["att_src1"],
                         params["att_dst1"], params["b1"]), 0.0)
    h1 = h1 * keep1.astype(jnp.float32) * inv
    h2 = jnp.maximum(gat(h1, params["w2"], params["att_src2"],
                         params["att_dst2"], params["b2"]), 0.0)
    sel = h2[gene_idx]
    f1 = jnp.maximum(sel @ params["wf1"] + params["bf1"], 0.0)
    f1 = f1 * keep2.astype(jnp.float32) * inv
    return jnp.sum(f1 * params["wf2_row"], axis=-1, keepdims=True) + params["bf2"]


if __name__ == "__main__":
    key = jax.random.PRNGKey(0)

    # Small synthetic batched graph: 4 graphs x 8 nodes, 1 input feature per node.
    num_graphs = 4            # graph.num_graphs == y.size(0)
    nodes_per_graph = 8
    N = num_graphs * nodes_per_graph
    d = 1
    gene_idx0 = 3             # graph.gene_idx_[0]

    ks = jax.random.split(key, 12)
    params = {
        # GATConv(d, 16): lin weight (16, d) stored transposed as (d, 16)
        "w1": jax.random.normal(ks[0], (d, 16), jnp.float32) * 0.5,
        "att_src1": jax.random.normal(ks[1], (1, 16), jnp.float32) * 0.5,
        "att_dst1": jax.random.normal(ks[2], (1, 16), jnp.float32) * 0.5,
        "b1": jnp.zeros((1, 16), jnp.float32),
        # GATConv(16, 16)
        "w2": jax.random.normal(ks[3], (16, 16), jnp.float32) * 0.25,
        "att_src2": jax.random.normal(ks[4], (1, 16), jnp.float32) * 0.5,
        "att_dst2": jax.random.normal(ks[5], (1, 16), jnp.float32) * 0.5,
        "b2": jnp.zeros((1, 16), jnp.float32),
        # fc1: Linear(16, 8) weight (8, 16) stored transposed; fc2: Linear(8, 1)
        # stored as a (1, 8) row so the kernel can use a VPU row-dot.
        "wf1": jax.random.normal(ks[6], (16, 8), jnp.float32) * 0.25,
        "bf1": jnp.zeros((1, 8), jnp.float32),
        "wf2_row": jax.random.normal(ks[7], (1, 8), jnp.float32) * 0.35,
        "bf2": jnp.zeros((1, 1), jnp.float32),
    }

    # graph.x
    x = jax.random.normal(ks[8], (N, d), jnp.float32)

    # graph.edge_index: directed ring (both directions) + a chord within each graph
    # (PyG batching: no cross-graph edges -> block-diagonal adjacency).
    src_list, dst_list = [], []
    for g in range(num_graphs):
        off = g * nodes_per_graph
        for i in range(nodes_per_graph):
            src_list += [off + i, off + (i + 1) % nodes_per_graph, off + i]
            dst_list += [off + (i + 1) % nodes_per_graph, off + i,
                         off + (i + 3) % nodes_per_graph]
    src = jnp.array(src_list, jnp.int32)
    dst = jnp.array(dst_list, jnp.int32)

    # Dense adjacency with self loops (GATConv add_self_loops=True): adj[dst, src] = 1.
    adj = jnp.zeros((N, N), jnp.float32).at[dst, src].set(1.0)
    adj = jnp.maximum(adj, jnp.eye(N, dtype=jnp.float32))

    # Row indices: gene_idx[0] + i * int(N / num_graphs), i = 0 .. y.size(0) - 1.
    gene_idx = gene_idx0 + jnp.arange(num_graphs, dtype=jnp.int32) * nodes_per_graph

    # Dropout (torch F.dropout default training=True): host-side jax.random keep masks,
    # passed as int8 and scaled by 1/(1-p) in-kernel.
    # TODO(synk): torch's dropout RNG stream cannot be reproduced bit-exactly.
    keep1 = jax.random.bernoulli(ks[9], 1.0 - DROP_P, (N, HIDDEN)).astype(jnp.int8)
    keep2 = jax.random.bernoulli(ks[10], 1.0 - DROP_P, (num_graphs, 8)).astype(jnp.int8)

    # graphs_per_block=2 -> 2 blocks of 16 nodes: exercises the parallel grid axis
    # (default auto-packing would fill ~128 nodes per block for larger batches).
    out = gat_inference_forward(params, x, adj, gene_idx, keep1, keep2,
                                num_graphs=num_graphs, graphs_per_block=2)
    out = jax.block_until_ready(out)
    assert out.shape == (num_graphs, 1), out.shape
    assert bool(jnp.all(jnp.isfinite(out)))

    ref = _reference_forward(params, x, adj, gene_idx, keep1, keep2)
    assert bool(jnp.allclose(out, ref, rtol=1e-2, atol=1e-3)), (out, ref)

    print("KERNEL_OK")
</pallas_src>

<mosaic_0001>
module attributes {stable_mosaic.version = 11 : i64} {
  func.func @_gat_block_kernel(%arg0: i32, %arg1: memref<1xi32, #tpu.memory_space<smem>>, %arg2: memref<1x16x1xf32, #tpu.memory_space<vmem>>, %arg3: memref<1x16x16xi8, #tpu.memory_space<vmem>>, %arg4: memref<56x16xf32, #tpu.memory_space<vmem>>, %arg5: memref<1x16x16xi8, #tpu.memory_space<vmem>>, %arg6: memref<1x2x16xi8, #tpu.memory_space<vmem>>, %arg7: memref<1x2x1xf32, #tpu.memory_space<vmem>>) attributes {dimension_semantics = [#tpu.dimension_semantics<parallel>], iteration_bounds = array<i64: 2>, scalar_prefetch = 1 : i64, scratch_operands = 0 : i64, tpu.core_type = #tpu.core_type<tc>, window_params = [{transform_indices = @transform_0, window_bounds = array<i64: 1, 16, 1>}, {transform_indices = @transform_1, window_bounds = array<i64: 1, 16, 16>}, {pipeline_mode = #tpu.pipeline_mode<synchronous>, transform_indices = @transform_2, window_bounds = array<i64: 56, 16>}, {transform_indices = @transform_3, window_bounds = array<i64: 1, 16, 16>}, {transform_indices = @transform_4, window_bounds = array<i64: 1, 2, 16>}, {transform_indices = @transform_5, window_bounds = array<i64: 1, 2, 1>}]} {
    %c0 = arith.constant 0 : index
    %c0_0 = arith.constant 0 : index
    %c0_1 = arith.constant 0 : index
    %0 = vector.load %arg3[%c0, %c0_0, %c0_1] : memref<1x16x16xi8, #tpu.memory_space<vmem>>, vector<1x16x16xi8>
    %1 = vector.shape_cast %0 : vector<1x16x16xi8> to vector<16x16xi8>
    %2 = arith.sitofp %1 : vector<16x16xi8> to vector<16x16xf32>
    %c0_2 = arith.constant 0 : index
    %c0_3 = arith.constant 0 : index
    %c0_4 = arith.constant 0 : index
    %3 = vector.load %arg2[%c0_2, %c0_3, %c0_4] : memref<1x16x1xf32, #tpu.memory_space<vmem>>, vector<1x16x1xf32>
    %4 = vector.shape_cast %3 : vector<1x16x1xf32> to vector<16x1xf32>
    %c8 = arith.constant 8 : index
    %c0_5 = arith.constant 0 : index
    %5 = vector.load %arg4[%c8, %c0_5] : memref<56x16xf32, #tpu.memory_space<vmem>>, vector<16x16xf32>
    %c24 = arith.constant 24 : index
    %c0_6 = arith.constant 0 : index
    %6 = vector.load %arg4[%c24, %c0_6] : memref<56x16xf32, #tpu.memory_space<vmem>>, vector<16x16xf32>
    %c40 = arith.constant 40 : index
    %c0_7 = arith.constant 0 : index
    %7 = vector.load %arg4[%c40, %c0_7] : memref<56x16xf32, #tpu.memory_space<vmem>>, vector<1x16xf32>
    %c41 = arith.constant 41 : index
    %c0_8 = arith.constant 0 : index
    %8 = vector.load %arg4[%c41, %c0_8] : memref<56x16xf32, #tpu.memory_space<vmem>>, vector<1x16xf32>
    %c42 = arith.constant 42 : index
    %c0_9 = arith.constant 0 : index
    %9 = vector.load %arg4[%c42, %c0_9] : memref<56x16xf32, #tpu.memory_space<vmem>>, vector<1x16xf32>
    %c43 = arith.constant 43 : index
    %c0_10 = arith.constant 0 : index
    %10 = vector.load %arg4[%c43, %c0_10] : memref<56x16xf32, #tpu.memory_space<vmem>>, vector<1x16xf32>
    %c44 = arith.constant 44 : index
    %c0_11 = arith.constant 0 : index
    %11 = vector.load %arg4[%c44, %c0_11] : memref<56x16xf32, #tpu.memory_space<vmem>>, vector<1x16xf32>
    %c45 = arith.constant 45 : index
    %c0_12 = arith.constant 0 : index
    %12 = vector.load %arg4[%c45, %c0_12] : memref<56x16xf32, #tpu.memory_space<vmem>>, vector<1x16xf32>
    %c46 = arith.constant 46 : index
    %c0_13 = arith.constant 0 : index
    %13 = vector.load %arg4[%c46, %c0_13] : memref<56x16xf32, #tpu.memory_space<vmem>>, vector<1x16xf32>
    %c47 = arith.constant 47 : index
    %c0_14 = arith.constant 0 : index
    %14 = vector.load %arg4[%c47, %c0_14] : memref<56x16xf32, #tpu.memory_space<vmem>>, vector<1x16xf32>
    %c48 = arith.constant 48 : index
    %c0_15 = arith.constant 0 : index
    %15 = vector.load %arg4[%c48, %c0_15] : memref<56x16xf32, #tpu.memory_space<vmem>>, vector<1x1xf32>
    %c0_16 = arith.constant 0 : index
    %c0_17 = arith.constant 0 : index
    %16 = vector.load %arg4[%c0_16, %c0_17] : memref<56x16xf32, #tpu.memory_space<vmem>>, vector<1x16xf32>
    %17 = vector.broadcast %4 : vector<16x1xf32> to vector<16x16xf32>
    %18 = vector.broadcast %16 : vector<1x16xf32> to vector<16x16xf32>
    %19 = arith.mulf %17, %18 : vector<16x16xf32>
    %20 = vector.broadcast %7 : vector<1x16xf32> to vector<16x16xf32>
    %21 = arith.mulf %19, %20 : vector<16x16xf32>
    %cst = arith.constant dense<0.000000e+00> : vector<16xf32>
    %22 = vector.multi_reduction <add>, %21, %cst [1] : vector<16x16xf32> to vector<16xf32>
    %23 = vector.shape_cast %22 : vector<16xf32> to vector<16x1xf32>
    %24 = vector.broadcast %8 : vector<1x16xf32> to vector<16x16xf32>
    %25 = arith.mulf %19, %24 : vector<16x16xf32>
    %cst_18 = arith.constant dense<0.000000e+00> : vector<16xf32>
    %26 = vector.multi_reduction <add>, %25, %cst_18 [1] : vector<16x16xf32> to vector<16xf32>
    %27 = vector.shape_cast %26 : vector<16xf32> to vector<16x1xf32>
    %28 = tpu.transpose %23, [1, 0] : vector<16x1xf32> -> vector<1x16xf32>
    %29 = vector.broadcast %27 : vector<16x1xf32> to vector<16x16xf32>
    %30 = vector.broadcast %28 : vector<1x16xf32> to vector<16x16xf32>
    %31 = arith.addf %29, %30 : vector<16x16xf32>
    %cst_19 = arith.constant 0.000000e+00 : f32
    %32 = vector.broadcast %cst_19 : f32 to vector<16x16xf32>
    %33 = arith.cmpf ogt, %31, %32 : vector<16x16xf32>
    %cst_20 = arith.constant 2.000000e-01 : f32
    %34 = vector.broadcast %cst_20 : f32 to vector<16x16xf32>
    %35 = arith.mulf %34, %31 : vector<16x16xf32>
    %36 = arith.select %33, %31, %35 : vector<16x16xi1>, vector<16x16xf32>
    %cst_21 = arith.constant 5.000000e-01 : f32
    %37 = vector.broadcast %cst_21 : f32 to vector<16x16xf32>
    %38 = arith.cmpf ogt, %2, %37 : vector<16x16xf32>
    %cst_22 = arith.constant -1.000000e+30 : f32
    %39 = vector.broadcast %cst_22 : f32 to vector<16x16xf32>
    %40 = arith.select %38, %36, %39 : vector<16x16xi1>, vector<16x16xf32>
    %cst_23 = arith.constant dense<0xFF800000> : vector<16xf32>
    %41 = vector.multi_reduction <maximumf>, %40, %cst_23 [1] : vector<16x16xf32> to vector<16xf32>
    %42 = vector.shape_cast %41 : vector<16xf32> to vector<16x1xf32>
    %43 = vector.broadcast %42 : vector<16x1xf32> to vector<16x16xf32>
    %44 = arith.subf %40, %43 : vector<16x16xf32>
    %45 = math.exp %44 : vector<16x16xf32>
    %cst_24 = arith.constant dense<0.000000e+00> : vector<16xf32>
    %46 = vector.multi_reduction <add>, %45, %cst_24 [1] : vector<16x16xf32> to vector<16xf32>
    %47 = vector.shape_cast %46 : vector<16xf32> to vector<16x1xf32>
    %48 = tpu.reciprocal %47 {approx = true} : vector<16x1xf32> -> vector<16x1xf32>
    %49 = vector.broadcast %48 : vector<16x1xf32> to vector<16x16xf32>
    %50 = arith.mulf %45, %49 : vector<16x16xf32>
    %cst_25 = arith.constant dense<0.000000e+00> : vector<16x16xf32>
    %51 = tpu.matmul %50, %19, %cst_25 {dimension_numbers = #tpu.dot_dimension_numbers<[1], [0], [0], [1], [0, 0, 1, 1], [], []>} : vector<16x16xf32>, vector<16x16xf32>, vector<16x16xf32> -> vector<16x16xf32>
    %52 = vector.broadcast %9 : vector<1x16xf32> to vector<16x16xf32>
    %53 = arith.addf %51, %52 : vector<16x16xf32>
    %cst_26 = arith.constant 0.000000e+00 : f32
    %54 = vector.broadcast %cst_26 : f32 to vector<16x16xf32>
    %55 = arith.maximumf %53, %54 : vector<16x16xf32>
    %c0_27 = arith.constant 0 : index
    %c0_28 = arith.constant 0 : index
    %c0_29 = arith.constant 0 : index
    %56 = vector.load %arg5[%c0_27, %c0_28, %c0_29] : memref<1x16x16xi8, #tpu.memory_space<vmem>>, vector<1x16x16xi8>
    %57 = vector.shape_cast %56 : vector<1x16x16xi8> to vector<16x16xi8>
    %58 = arith.sitofp %57 : vector<16x16xi8> to vector<16x16xf32>
    %cst_30 = arith.constant 1.66666663 : f32
    %59 = vector.broadcast %cst_30 : f32 to vector<16x16xf32>
    %60 = arith.mulf %58, %59 : vector<16x16xf32>
    %61 = arith.mulf %55, %60 : vector<16x16xf32>
    %cst_31 = arith.constant dense<0.000000e+00> : vector<16x16xf32>
    %62 = tpu.matmul %61, %5, %cst_31 {dimension_numbers = #tpu.dot_dimension_numbers<[1], [0], [0], [1], [0, 0, 1, 1], [], []>} : vector<16x16xf32>, vector<16x16xf32>, vector<16x16xf32> -> vector<16x16xf32>
    %63 = vector.broadcast %10 : vector<1x16xf32> to vector<16x16xf32>
    %64 = arith.mulf %62, %63 : vector<16x16xf32>
    %cst_32 = arith.constant dense<0.000000e+00> : vector<16xf32>
    %65 = vector.multi_reduction <add>, %64, %cst_32 [1] : vector<16x16xf32> to vector<16xf32>
    %66 = vector.shape_cast %65 : vector<16xf32> to vector<16x1xf32>
    %67 = tpu.iota {dimensions = array<i32: 1>} : vector<2x16xi32>
    %68 = tpu.iota {dimensions = array<i32: 0>} : vector<2x16xi32>
    %c0_33 = arith.constant 0 : index
    %69 = memref.load %arg1[%c0_33] : memref<1xi32, #tpu.memory_space<smem>>
    %c8_i32 = arith.constant 8 : i32
    %70 = vector.broadcast %c8_i32 : i32 to vector<2x16xi32>
    %71 = arith.muli %68, %70 : vector<2x16xi32>
    %72 = vector.broadcast %69 : i32 to vector<2x16xi32>
    %73 = arith.addi %72, %71 : vector<2x16xi32>
    %74 = arith.cmpi eq, %67, %73 : vector<2x16xi32>
    %75 = arith.extui %74 : vector<2x16xi1> to vector<2x16xi32>
    %76 = arith.sitofp %75 : vector<2x16xi32> to vector<2x16xf32>
    %cst_34 = arith.constant dense<0.000000e+00> : vector<2x16xf32>
    %77 = tpu.matmul %76, %62, %cst_34 {dimension_numbers = #tpu.dot_dimension_numbers<[1], [0], [0], [1], [0, 0, 1, 1], [], []>} : vector<2x16xf32>, vector<16x16xf32>, vector<2x16xf32> -> vector<2x16xf32>
    %cst_35 = arith.constant dense<0.000000e+00> : vector<2x16xf32>
    %78 = tpu.matmul %76, %2, %cst_35 {dimension_numbers = #tpu.dot_dimension_numbers<[1], [0], [0], [1], [0, 0, 1, 1], [], []>} : vector<2x16xf32>, vector<16x16xf32>, vector<2x16xf32> -> vector<2x16xf32>
    %79 = vector.broadcast %11 : vector<1x16xf32> to vector<2x16xf32>
    %80 = arith.mulf %77, %79 : vector<2x16xf32>
    %cst_36 = arith.constant dense<0.000000e+00> : vector<2xf32>
    %81 = vector.multi_reduction <add>, %80, %cst_36 [1] : vector<2x16xf32> to vector<2xf32>
    %82 = vector.shape_cast %81 : vector<2xf32> to vector<2x1xf32>
    %83 = tpu.transpose %66, [1, 0] : vector<16x1xf32> -> vector<1x16xf32>
    %84 = vector.broadcast %82 : vector<2x1xf32> to vector<2x16xf32>
    %85 = vector.broadcast %83 : vector<1x16xf32> to vector<2x16xf32>
    %86 = arith.addf %84, %85 : vector<2x16xf32>
    %cst_37 = arith.constant 0.000000e+00 : f32
    %87 = vector.broadcast %cst_37 : f32 to vector<2x16xf32>
    %88 = arith.cmpf ogt, %86, %87 : vector<2x16xf32>
    %cst_38 = arith.constant 2.000000e-01 : f32
    %89 = vector.broadcast %cst_38 : f32 to vector<2x16xf32>
    %90 = arith.mulf %89, %86 : vector<2x16xf32>
    %91 = arith.select %88, %86, %90 : vector<2x16xi1>, vector<2x16xf32>
    %cst_39 = arith.constant 5.000000e-01 : f32
    %92 = vector.broadcast %cst_39 : f32 to vector<2x16xf32>
    %93 = arith.cmpf ogt, %78, %92 : vector<2x16xf32>
    %cst_40 = arith.constant -1.000000e+30 : f32
    %94 = vector.broadcast %cst_40 : f32 to vector<2x16xf32>
    %95 = arith.select %93, %91, %94 : vector<2x16xi1>, vector<2x16xf32>
    %cst_41 = arith.constant dense<0xFF800000> : vector<2xf32>
    %96 = vector.multi_reduction <maximumf>, %95, %cst_41 [1] : vector<2x16xf32> to vector<2xf32>
    %97 = vector.shape_cast %96 : vector<2xf32> to vector<2x1xf32>
    %98 = vector.broadcast %97 : vector<2x1xf32> to vector<2x16xf32>
    %99 = arith.subf %95, %98 : vector<2x16xf32>
    %100 = math.exp %99 : vector<2x16xf32>
    %cst_42 = arith.constant dense<0.000000e+00> : vector<2xf32>
    %101 = vector.multi_reduction <add>, %100, %cst_42 [1] : vector<2x16xf32> to vector<2xf32>
    %102 = vector.shape_cast %101 : vector<2xf32> to vector<2x1xf32>
    %103 = tpu.reciprocal %102 {approx = true} : vector<2x1xf32> -> vector<2x1xf32>
    %104 = vector.broadcast %103 : vector<2x1xf32> to vector<2x16xf32>
    %105 = arith.mulf %100, %104 : vector<2x16xf32>
    %cst_43 = arith.constant dense<0.000000e+00> : vector<2x16xf32>
    %106 = tpu.matmul %105, %62, %cst_43 {dimension_numbers = #tpu.dot_dimension_numbers<[1], [0], [0], [1], [0, 0, 1, 1], [], []>} : vector<2x16xf32>, vector<16x16xf32>, vector<2x16xf32> -> vector<2x16xf32>
    %107 = vector.broadcast %12 : vector<1x16xf32> to vector<2x16xf32>
    %108 = arith.addf %106, %107 : vector<2x16xf32>
    %cst_44 = arith.constant 0.000000e+00 : f32
    %109 = vector.broadcast %cst_44 : f32 to vector<2x16xf32>
    %110 = arith.maximumf %108, %109 : vector<2x16xf32>
    %cst_45 = arith.constant dense<0.000000e+00> : vector<2x16xf32>
    %111 = tpu.matmul %110, %6, %cst_45 {dimension_numbers = #tpu.dot_dimension_numbers<[1], [0], [0], [1], [0, 0, 1, 1], [], []>} : vector<2x16xf32>, vector<16x16xf32>, vector<2x16xf32> -> vector<2x16xf32>
    %112 = vector.broadcast %13 : vector<1x16xf32> to vector<2x16xf32>
    %113 = arith.addf %111, %112 : vector<2x16xf32>
    %cst_46 = arith.constant 0.000000e+00 : f32
    %114 = vector.broadcast %cst_46 : f32 to vector<2x16xf32>
    %115 = arith.maximumf %113, %114 : vector<2x16xf32>
    %c0_47 = arith.constant 0 : index
    %c0_48 = arith.constant 0 : index
    %c0_49 = arith.constant 0 : index
    %116 = vector.load %arg6[%c0_47, %c0_48, %c0_49] : memref<1x2x16xi8, #tpu.memory_space<vmem>>, vector<1x2x16xi8>
    %117 = vector.shape_cast %116 : vector<1x2x16xi8> to vector<2x16xi8>
    %118 = arith.sitofp %117 : vector<2x16xi8> to vector<2x16xf32>
    %cst_50 = arith.constant 1.66666663 : f32
    %119 = vector.broadcast %cst_50 : f32 to vector<2x16xf32>
    %120 = arith.mulf %118, %119 : vector<2x16xf32>
    %121 = arith.mulf %115, %120 : vector<2x16xf32>
    %122 = vector.broadcast %14 : vector<1x16xf32> to vector<2x16xf32>
    %123 = arith.mulf %121, %122 : vector<2x16xf32>
    %cst_51 = arith.constant dense<0.000000e+00> : vector<2xf32>
    %124 = vector.multi_reduction <add>, %123, %cst_51 [1] : vector<2x16xf32> to vector<2xf32>
    %125 = vector.shape_cast %124 : vector<2xf32> to vector<2x1xf32>
    %126 = vector.broadcast %15 : vector<1x1xf32> to vector<2x1xf32>
    %127 = arith.addf %125, %126 : vector<2x1xf32>
    %c0_52 = arith.constant 0 : index
    %c0_53 = arith.constant 0 : index
    %c0_54 = arith.constant 0 : index
    %128 = vector.load %arg7[%c0_52, %c0_53, %c0_54] : memref<1x2x1xf32, #tpu.memory_space<vmem>>, vector<1x2x1xf32>
    %129 = vector.shape_cast %128 : vector<1x2x1xf32> to vector<2x1xf32>
    %130 = vector.shape_cast %127 : vector<2x1xf32> to vector<1x2x1xf32>
    tpu.vector_store %arg7[%c0_52, %c0_53, %c0_54], %130 {strides = array<i32>} : memref<1x2x1xf32, #tpu.memory_space<vmem>>, vector<1x2x1xf32>,
    return
  }
  func.func @transform_0(%arg0: i32, %arg1: memref<1xi32, #tpu.memory_space<smem>>) -> (i32, i32, i32) {
    %c0_i32 = arith.constant 0 : i32
    %c0_i32_0 = arith.constant 0 : i32
    %c0_i32_1 = arith.constant 0 : i32
    return %arg0, %c0_i32, %c0_i32_0 : i32, i32, i32
  }
  func.func @transform_1(%arg0: i32, %arg1: memref<1xi32, #tpu.memory_space<smem>>) -> (i32, i32, i32) {
    %c0_i32 = arith.constant 0 : i32
    %c0_i32_0 = arith.constant 0 : i32
    %c0_i32_1 = arith.constant 0 : i32
    return %arg0, %c0_i32, %c0_i32_0 : i32, i32, i32
  }
  func.func @transform_2(%arg0: i32, %arg1: memref<1xi32, #tpu.memory_space<smem>>) -> (i32, i32) {
    %c0_i32 = arith.constant 0 : i32
    %c0_i32_0 = arith.constant 0 : i32
    %c0_i32_1 = arith.constant 0 : i32
    return %c0_i32, %c0_i32_0 : i32, i32
  }
  func.func @transform_3(%arg0: i32, %arg1: memref<1xi32, #tpu.memory_space<smem>>) -> (i32, i32, i32) {
    %c0_i32 = arith.constant 0 : i32
    %c0_i32_0 = arith.constant 0 : i32
    %c0_i32_1 = arith.constant 0 : i32
    return %arg0, %c0_i32, %c0_i32_0 : i32, i32, i32
  }
  func.func @transform_4(%arg0: i32, %arg1: memref<1xi32, #tpu.memory_space<smem>>) -> (i32, i32, i32) {
    %c0_i32 = arith.constant 0 : i32
    %c0_i32_0 = arith.constant 0 : i32
    %c0_i32_1 = arith.constant 0 : i32
    return %arg0, %c0_i32, %c0_i32_0 : i32, i32, i32
  }
  func.func @transform_5(%arg0: i32, %arg1: memref<1xi32, #tpu.memory_space<smem>>) -> (i32, i32, i32) {
    %c0_i32 = arith.constant 0 : i32
    %c0_i32_0 = arith.constant 0 : i32
    %c0_i32_1 = arith.constant 0 : i32
    return %arg0, %c0_i32, %c0_i32_0 : i32, i32, i32
  }
}

</mosaic_0001>

<bundles_post_ra>
// kernel: tpu_custom_call.1
= control target key start
LH: loop header
LB: loop body
LE: loop exit
PB: predicated region body
PF: predicated region fallthrough
CT: control target
= control target key end

     0   :  { %s855_s23 = smov 0   ;;  %s955_s0 = inlined_call_operand.<no memory space> [shape: s32[1], index: 0, kind: input, shape index: {}]   ;;  %s956_s1 = inlined_call_operand.vmem [shape: f32[2,16,1], index: 1, kind: input, shape index: {}]   ;;  %s957_s2 = inlined_call_operand.vmem [shape: s8[2,16,16], index: 2, kind: input, shape index: {}]   ;;  %s958_s3 = inlined_call_operand.vmem [shape: f32[56,16], index: 3, kind: input, shape index: {}]   ;;  %s959_s4 = inlined_call_operand.vmem [shape: s8[2,16,16], index: 4, kind: input, shape index: {}]   ;;  %s960_s5 = inlined_call_operand.vmem [shape: s8[2,2,16], index: 5, kind: input, shape index: {}]   ;;  %s961_s6 = inlined_call_operand.vmem [shape: f32[2,2,1], index: 6, kind: output, shape index: {}]  }
   0x1   :  { %11 = sst [smem:[#allocation3]] %s955_s0 }
   0x2 LB: > { %s740_s24 = sadd.s32 4294967295, %s813_s23   ;;  %p744_p0 = scmp.ge.s32.totalorder %s813_s23, 1  ;;  %s813_s23 = sphi %s855_s23, %s17_s23  }
   0x3   : > { %p217_p1 = scmp.lt.s32.totalorder %s813_s23, 3 }
   0x5   : > { %p218_p2 = pnand %p744_p0, %p217_p1 }
   0x6   : > { %p257_p3 = scmp.lt.s32.totalorder (!%p218_p2), %s740_s24, 1 }
   0x7   : > { %221 = sbr.rel (%p218_p2) target bundleno = 1869 (0x74d), region = 40 }
   0xc   : > { %v815_v0 = vmov 0   ;;  %s963_s24 = smov (!%p257_p3, %s740_s24), 1  ;;  %v785_v3 = vld [vmem:[%s958_s3] ss:$0 sm:$0xff]  ;;  %v786_v4 = vld [vmem:[%s958_s3 + $0x29] ss:$0 sm:$0xff] }
   0xd   : > { %784 = vset.pattern.permute.xlu0 %v815_v0  ;;  %s763_s0 = sshll.u32 %s963_s24, 4  ;;  %v787_v5 = vld [vmem:[%s958_s3 + $0x28] ss:$0 sm:$0xff]  ;;  %vm317_vm0 = vcmask 130048   ;;  %s764_s10 = sshll.u32 %s963_s24, 2  ;;  %v288_v55 = vld [vmem:[%s958_s3 + $0x10] sm:$0xff] }
   0xe   : > { %s261_s27 = scalar_lea.vmem %s956_s1, %s763_s0  ;;  %s266_s13 = scalar_lea.vmem %s957_s2, %s764_s10  ;;  %462 = vmatpush.msra.mxu1 %v288_v55  ;;  %v287_v56 = vld [vmem:[%s958_s3 + $0x8] sm:$0xff]  ;;  %vm536_vm6 = vcmask 123904   ;;  %vm652_vm9 = vcmask 1024  }
   0xf   : > { %v285_v1 = vld [vmem:[%s261_s27] sm:$0xff]  ;;  %v286_v2 = vld [vmem:[%s261_s27 + $0x8] sm:$0xff]  ;;  %s271_s20 = scalar_lea.vmem %s959_s4, %s764_s10  ;;  %s484_s0 = sld [smem:[#allocation3]] }
  0x10   : > { %303 = vperm.xlu0 %784, %v285_v1   ;;  %v767_v20 = vld [vmem:[%s266_s13] sm:$0xf]   ;;  %463 = vmatpush.msra.mxu1 %v287_v56  ;;  %v788_v59 = vld [vmem:[%s958_s3 + $0x2a] ss:$0 sm:$0xff]  ;;  %s274_s13 = scalar_lea.vmem %s960_s5, %s963_s24  ;;  %v792_v55 = vld [vmem:[%s958_s3 + $0x2e] ss:$0 sm:$0xff] }
  0x11   : > { %v769_v21 = vunpack.c.1.s8 %v767_v20  ;;  %v768_v22 = vunpack.c.0.s8 %v767_v20  ;;  %v771_v57 = vld [vmem:[%s271_s20] sm:$0xf]   ;;  %s751_s18 = sshll.u32 %s963_s24, 1 }
  0x12   : > { %v772_v58 = vunpack.c.0.s8 %v771_v57  ;;  %v773_v0 = vunpack.c.1.s8 %v771_v57 }
  0x13   : > { %v284_v23 = vcvt.s32.f32 %v769_v21  ;;  %v283_v24 = vcvt.s32.f32 %v768_v22 }
  0x14   : > { %v436_v60 = vcvt.s32.f32 %v772_v58 }
  0x15   : > { %528 = vmatpush.msra.mxu3 %v284_v23  ;;  %vm375_vm1 = vcmp.gt.f32.partialorder %v284_v23, 0.5  ;;  %vm374_vm2 = vcmp.gt.f32.partialorder %v283_v24, 0.5 }
  0x16   : > { %v438_v63 = vmul.f32 1.6666666, %v436_v60 }
  0x17   : > { %529 = vmatpush.msra.mxu3 %v283_v24 }
  0x18   : > { %308 = vperm.xlu0 %784, %v286_v2  }
  0x82   : > { %v304_v6 = vpop.permute.xlu0 %303 }
  0x83   : > { %v312_v7 = vmul.f32 %v785_v3, %v304_v6 }
  0x85   : > { %v325_v8 = vmul.f32 %v786_v4, %v312_v7  ;;  %v315_v9 = vmul.f32 %v787_v5, %v312_v7 }
  0x87   : > { %v327_v10 = vsel %vm317_vm0, %v325_v8, 0.0  ;;  %v318_v11 = vsel %vm317_vm0, %v315_v9, 0.0  ;;  %v480_v9 = vlaneseq }
  0x88   : > { %328 = vadd.xlane.f32.xlu2 %v327_v10  ;;  %319 = vadd.xlane.f32.xlu1 %v318_v11  ;;  %v486_v11 = vstv %s484_s0  ;;  %s278_s0 = scalar_lea.vmem %s961_s6, %s751_s18 }
  0x89   : > { %v483_v10 = vshrl.u32 %v480_v9, 7 }
  0x8a   : > { %v309_v12 = vpop.permute.xlu0 %308 }
  0x8b   : > { %v313_v13 = vmul.f32 %v785_v3, %v309_v12  ;;  %v437_v3 = vcvt.s32.f32 %v773_v0  ;;  %v481_v12 = vand.u32 127, %v480_v9 }
  0x8d   : > { %421 = vmatpush.msra.mxu0 %v313_v13  ;;  %v326_v14 = vmul.f32 %v786_v4, %v313_v13  ;;  %v316_v15 = vmul.f32 %v787_v5, %v313_v13  ;;  %v439_v6 = vmul.f32 1.6666666, %v437_v3  ;;  %v485_v13 = vmul.u32 8, %v483_v10 }
  0x8f   : > { %422 = vmatpush.msra.mxu0 %v312_v7  ;;  %v330_v16 = vsel %vm317_vm0, %v326_v14, 0.0  ;;  %v321_v17 = vsel %vm317_vm0, %v316_v15, 0.0  ;;  %v487_v14 = vadd.s32 %v486_v11, %v485_v13  ;;  %v816_v15 = vmov 0.0  }
  0x90   : > { %331 = vadd.xlane.f32.xlu2 %v330_v16  ;;  %322 = vadd.xlane.f32.xlu1 %v321_v17  ;;  %v789_v17 = vld [vmem:[%s958_s3 + $0x2b] ss:$0 sm:$0xff] }
  0x91   : > { %vm488_vm5 = vcmp.eq.s32.totalorder %v481_v12, %v487_v14 }
  0x92   : > { %v756_v16 = vsel %vm488_vm5, 1.0, %v816_v15 }
  0x93   : > { %758 = vmatmul.msk.f32.vlgmr.msra.gmra.mxu3 %vm317_vm0, %v756_v16 }
  0xfb   : > { %v320_v18 = vpop.xlane.xlu1 %319  ;;  %v329_v25 = vpop.xlane.xlu2 %328 }
  0xfc   : > { %333 = vxpose.xlu0.b32.start [1/2] (short) (narrow) %v320_v18, 8 }
 0x103   : > { %v323_v19 = vpop.xlane.xlu1 %322  ;;  %v332_v28 = vpop.xlane.xlu2 %331 }
 0x104   : > { %334 = vxpose.xlu0.b32.end [2/2] (short) (narrow) %v323_v19, 8 }
 0x1a0   : > { %v349_v26 = vpop.trf.xlu0 }
 0x1a1   : > { %v365_v27 = vperm.slane %v349_v26, 0  ;;  %v790_v26 = vld [vmem:[%s958_s3 + $0x2c] ss:$0 sm:$0xff] }
 0x1a3   : > { %v366_v29 = vadd.f32 %v365_v27, %v329_v25  ;;  %v367_v30 = vadd.f32 %v365_v27, %v332_v28 }
 0x1a5   : > { %vm369_vm3 = vcmp.gt.f32.partialorder %v367_v30, 0.0  ;;  %v371_v31 = vmul.f32 0.2, %v367_v30  ;;  %vm368_vm4 = vcmp.gt.f32.partialorder %v366_v29, 0.0  ;;  %v370_v32 = vmul.f32 0.2, %v366_v29 }
 0x1a7   : > { %v373_v33 = vsel %vm369_vm3, %v367_v30, %v371_v31  ;;  %v372_v34 = vsel %vm368_vm4, %v366_v29, %v370_v32 }
 0x1a8   : > { %v377_v35 = vsel %vm375_vm1, %v373_v33, -1e+30  ;;  %v376_v36 = vsel %vm374_vm2, %v372_v34, -1e+30  ;;  %v531_v33 = vpop.f32.mrf.mxu3 }
 0x1a9   : > { %v381_v37 = vsel %vm317_vm0, %v377_v35, -inf  ;;  %v378_v38 = vsel %vm317_vm0, %v376_v36, -inf  ;;  %vm577_vm7 = vcmp.gt.f32.partialorder %v531_v33, 0.5 }
 0x1aa   : > { %382 = vmax.xlane.f32.xlu2 %v381_v37  ;;  %379 = vmax.xlane.f32.xlu1 %v378_v38 }
 0x21d   : > { %v383_v39 = vpop.xlane.xlu2 %382  ;;  %v380_v40 = vpop.xlane.xlu1 %379 }
 0x21e   : > { %v385_v41 = vsub.f32 %v377_v35, %v383_v39  ;;  %v384_v42 = vsub.f32 %v376_v36, %v380_v40 }
 0x220   : > { %v388_v43 = vmul.f32 1.442695, %v385_v41  ;;  %v386_v44 = vmul.f32 1.442695, %v384_v42 }
 0x222   : > { %795 = vpow2.f32 %v388_v43 }
 0x223   : > { %797 = vpow2.f32 %v386_v44  ;;  %v290_v44 = vld [vmem:[%s958_s3 + $0x20] sm:$0xff] }
 0x224   : > { %633 = vmatpush.msrb.mxu3 %v290_v44 }
 0x228   : > { %v796_v45 = vpop.eup %795 }
 0x229   : > { %v798_v46 = vpop.eup %797  ;;  %v393_v47 = vsel %vm317_vm0, %v796_v45, 0.0 }
 0x22a   : > { %394 = vadd.xlane.f32.xlu2 %v393_v47  ;;  %v390_v48 = vsel %vm317_vm0, %v798_v46, 0.0 }
 0x22b   : > { %391 = vadd.xlane.f32.xlu1 %v390_v48  ;;  %v289_v48 = vld [vmem:[%s958_s3 + $0x18] sm:$0xff] }
 0x22c   : > { %634 = vmatpush.msrb.mxu3 %v289_v48 }
 0x29d   : > { %v395_v50 = vpop.xlane.xlu2 %394 }
 0x29e   : > { %v392_v49 = vpop.xlane.xlu1 %391 }
 0x29f   : > { %799 = vrcp.f32 %v392_v49  ;;  %v791_v49 = vld [vmem:[%s958_s3 + $0x2d] ss:$0 sm:$0xff] }
 0x2a0   : > { %801 = vrcp.f32 %v395_v50 }
 0x2a5   : > { %v800_v51 = vpop.eup %799 }
 0x2a6   : > { %v398_v52 = vmul.f32 %v800_v51, %v798_v46  ;;  %v802_v53 = vpop.eup %801 }
 0x2a7   : > { %v399_v54 = vmul.f32 %v802_v53, %v796_v45  ;;  %v640_v53 = vld [vmem:[%s274_s13] sm:$0x1] }
 0x2a8   : > { %752 = vmatmul.msk.f32.vlgmr.msra.gmra.mxu0 %vm317_vm0, %v398_v52 }
 0x2b0   : > { %753 = vmatmul.msk.f32.gmra.mxu0 %vm317_vm0, %v399_v54  ;;  %v641_v54 = vunpack.c.0.s8 %v640_v53 }
 0x2b2   : > { %v642_v56 = vcvt.s32.f32 %v641_v54 }
 0x325   : > { %v424_v61 = vpop.f32.mrf.mxu0 }
 0x326   : > { %v425_v62 = vadd.f32 %v788_v59, %v424_v61  ;;  %v793_v61 = vld [vmem:[%s958_s3 + $0x2f] ss:$0 sm:$0xff] }
 0x328   : > { %v430_v1 = vmax.f32 %v425_v62, 0.0 }
 0x32a   : > { %v440_v2 = vmul.f32 %v438_v63, %v430_v1  ;;  %v794_v1 = vld [vmem:[%s958_s3 + $0x30] ss:$0 sm:$0xff] }
 0x32c   : > { %754 = vmatmul.msk.f32.vlgmr.msra.gmra.mxu1 %vm317_vm0, %v440_v2 }
 0x32d   : > { %v427_v4 = vpop.f32.mrf.mxu0 }
 0x32e   : > { %v428_v5 = vadd.f32 %v788_v59, %v427_v4  ;;  %v643_v59 = vmul.f32 1.6666666, %v642_v56 }
 0x330   : > { %v431_v7 = vmax.f32 %v428_v5, 0.0 }
 0x332   : > { %v441_v8 = vmul.f32 %v439_v6, %v431_v7 }
 0x334   : > { %755 = vmatmul.msk.f32.gmra.mxu1 %vm317_vm0, %v441_v8 }
 0x3a9   : > { %v465_v18 = vpop.f32.mrf.mxu1 }
 0x3aa   : > { %v472_v19 = vmul.f32 %v789_v17, %v465_v18 }
 0x3ac   : > { %v474_v20 = vsel %vm317_vm0, %v472_v19, 0.0 }
 0x3ad   : > { %475 = vadd.xlane.f32.xlu1 %v474_v20 }
 0x3b1   : > { %v468_v21 = vpop.f32.mrf.mxu1 }
 0x3b2   : > { %v473_v22 = vmul.f32 %v789_v17, %v468_v21  ;;  %508 = vmatpush.msra.mxu2 %v468_v21 }
 0x3b4   : > { %509 = vmatpush.msra.mxu2 %v465_v18  ;;  %v477_v23 = vsel %vm317_vm0, %v473_v22, 0.0 }
 0x3b5   : > { %478 = vadd.xlane.f32.xlu2 %v477_v23  ;;  %757 = vmatmul.msk.f32.vlgmr.msra.gmra.mxu2 %vm317_vm0, %v756_v16 }
 0x3b6   : > { %608 = vmatpush.msrb.mxu2 %v468_v21 }
 0x3b8   : > { %609 = vmatpush.msrb.mxu2 %v465_v18 }
 0x420   : > { %v476_v24 = vpop.xlane.xlu1 %475 }
 0x421   : > { %540 = vxpose.xlu2.b32.start [1/2] (short) (narrow) %v476_v24, 8 }
 0x428   : > { %v479_v25 = vpop.xlane.xlu2 %478 }
 0x429   : > { %541 = vxpose.xlu2.b32.end [2/2] (short) (narrow) %v479_v25, 8 }
 0x438   : > { %v511_v27 = vpop.f32.mrf.mxu2 }
 0x439   : > { %v535_v28 = vmul.f32 %v790_v26, %v511_v27 }
 0x43b   : > { %v537_v29 = vsel %vm536_vm6, %v535_v28, 0.0 }
 0x43c   : > { %538 = vadd.xlane.f32.xlu1 %v537_v29 }
 0x4af   : > { %v539_v31 = vpop.xlane.xlu1 %538 }
 0x4ba   : > { %v556_v30 = vpop.trf.xlu2 }
 0x4bb   : > { %v572_v32 = vperm.slane %v556_v30, 0 }
 0x4bd   : > { %v573_v34 = vadd.f32 %v572_v32, %v539_v31 }
 0x4bf   : > { %v575_v35 = vmul.f32 0.2, %v573_v34  ;;  %vm574_vm8 = vcmp.gt.f32.partialorder %v573_v34, 0.0 }
 0x4c1   : > { %v576_v36 = vsel %vm574_vm8, %v573_v34, %v575_v35 }
 0x4c2   : > { %v578_v37 = vsel %vm577_vm7, %v576_v36, -1e+30 }
 0x4c3   : > { %v579_v38 = vsel %vm536_vm6, %v578_v37, -inf }
 0x4c4   : > { %580 = vmax.xlane.f32.xlu1 %v579_v38 }
 0x537   : > { %v581_v39 = vpop.xlane.xlu1 %580 }
 0x538   : > { %v582_v40 = vsub.f32 %v578_v37, %v581_v39 }
 0x53a   : > { %v583_v41 = vmul.f32 1.442695, %v582_v40 }
 0x53c   : > { %803 = vpow2.f32 %v583_v41 }
 0x542   : > { %v804_v42 = vpop.eup %803 }
 0x543   : > { %v585_v43 = vsel %vm536_vm6, %v804_v42, 0.0 }
 0x544   : > { %586 = vadd.xlane.f32.xlu1 %v585_v43 }
 0x5b7   : > { %v587_v45 = vpop.xlane.xlu1 %586 }
 0x5b8   : > { %805 = vrcp.f32 %v587_v45 }
 0x5be   : > { %v806_v46 = vpop.eup %805 }
 0x5bf   : > { %v589_v47 = vmul.f32 %v806_v46, %v804_v42 }
 0x5c1   : > { %759 = vmatmul.msk.f32.vlgmr.msrb.gmra.mxu2 %vm317_vm0, %v589_v47 }
 0x644   : > { %v611_v50 = vpop.f32.mrf.mxu2 }
 0x645   : > { %v612_v51 = vadd.f32 %v791_v49, %v611_v50 }
 0x647   : > { %v614_v52 = vmax.f32 %v612_v51, 0.0 }
 0x649   : > { %760 = vmatmul.msk.f32.vlgmr.msrb.gmra.mxu3 %vm317_vm0, %v614_v52 }
 0x6cc   : > { %v636_v57 = vpop.f32.mrf.mxu3 }
 0x6cd   : > { %v637_v58 = vadd.f32 %v792_v55, %v636_v57 }
 0x6cf   : > { %v639_v60 = vmax.f32 %v637_v58, 0.0 }
 0x6d1   : > { %v644_v62 = vmul.f32 %v643_v59, %v639_v60 }
 0x6d3   : > { %v646_v63 = vmul.f32 %v793_v61, %v644_v62 }
 0x6d5   : > { %v647_v0 = vsel %vm536_vm6, %v646_v63, 0.0 }
 0x6d6   : > { %648 = vadd.xlane.f32.xlu0 %v647_v0 }
 0x749   : > { %v649_v2 = vpop.xlane.xlu0 %648 }
 0x74a   : > { %v651_v3 = vadd.f32 %v794_v1, %v649_v2 }
 0x74c   : > { %653 = vst.msk [vmem:[%s278_s0] sm:$0x3] %vm652_vm9, %v651_v3 }
 0x74d PF: > { %s17_s23 = sadd.s32 1, %s813_s23  }
 0x74e   : > { %p14_p4 = scmp.ge.s32.totalorder %s17_s23, 4  }
 0x750   :  { %16 = sbr.rel (!%p14_p4) target bundleno = 2 (0x2), region = 79 }

</bundles_post_ra>
